<compile_context>
chip_gen: v5e
topology: v5e:2x2
jax: 0.10.0
libtpu: 0.0.40
codegen_flags: <defaults>
</compile_context>

<pallas_src>
import jax
import jax.numpy as jnp
from jax.experimental import pallas as pl
from jax.experimental.pallas import tpu as pltpu

IN, OUT = 2, 3
LANES = 128  # lane-dense output width


def _linear_kernel(x_ref, w_ref, b_ref, o_ref):
    # x_ref: SMEM f32[2]        (input vector, 2 scalars)
    # w_ref: VMEM f32[8, 128]   (rows 0..1 hold W^T, cols 0..2 valid)
    # b_ref: VMEM f32[1, 128]   (row 0 holds bias, cols 0..2 valid)
    # o_ref: VMEM f32[1, 128]
    x0 = x_ref[0]
    x1 = x_ref[1]
    # Two splat-multiply-adds on the VPU; no MXU involvement.
    o_ref[...] = x0 * w_ref[0:1, :] + x1 * w_ref[1:2, :] + b_ref[...]


def prepare_params(weight, bias):
    """Done ONCE at model init: pack Linear(2,3) params into TPU-aligned tiles.

    weight: (3, 2) f32 (PyTorch layout), bias: (3,) f32.
    """
    w_p = jnp.zeros((8, LANES), jnp.float32).at[:IN, :OUT].set(
        weight.T.astype(jnp.float32))
    b_p = jnp.zeros((1, LANES), jnp.float32).at[0, :OUT].set(
        bias.astype(jnp.float32))
    return w_p, b_p


@jax.jit
def model_forward(x, w_p, b_p):
    """x: (2,) f32 -> (3,) f32, equivalent to Linear(2,3)(x) @ eye(3)."""
    out_p = pl.pallas_call(
        _linear_kernel,
        out_shape=jax.ShapeDtypeStruct((1, LANES), jnp.float32),
        in_specs=[
            pl.BlockSpec(memory_space=pltpu.MemorySpace.SMEM),  # x (scalars)
            pl.BlockSpec(memory_space=pltpu.MemorySpace.VMEM),  # W^T tile
            pl.BlockSpec(memory_space=pltpu.MemorySpace.VMEM),  # bias tile
        ],
        out_specs=pl.BlockSpec(memory_space=pltpu.MemorySpace.VMEM),
        cost_estimate=pl.CostEstimate(
            flops=2 * IN * OUT, transcendentals=0, bytes_accessed=4608),
    )(x.astype(jnp.float32), w_p, b_p)
    return out_p[0, :OUT]


if __name__ == "__main__":
    key = jax.random.PRNGKey(0)
    kx, kw, kb = jax.random.split(key, 3)

    # input: matches `x = torch.randn(2)`
    x = jax.random.normal(kx, (2,), dtype=jnp.float32)

    # deterministic Linear(2, 3) parameters (PyTorch-style uniform init)
    bound = 1.0 / jnp.sqrt(2.0)
    weight = jax.random.uniform(kw, (3, 2), dtype=jnp.float32,
                                minval=-bound, maxval=bound)
    bias = jax.random.uniform(kb, (3,), dtype=jnp.float32,
                              minval=-bound, maxval=bound)

    # parameter tiles built once at init (not per forward call)
    w_p, b_p = prepare_params(weight, bias)

    out = model_forward(x, w_p, b_p)
    jax.block_until_ready(out)

    # reference check in plain JAX (includes the identity matmul of the spec)
    ref = (x @ weight.T + bias) @ jnp.eye(3, dtype=jnp.float32)
    assert out.shape == (3,)
    assert jnp.allclose(out, ref, atol=1e-5, rtol=1e-5)

    print("KERNEL_OK")
</pallas_src>

<mosaic_0001>
module attributes {stable_mosaic.version = 11 : i64} {
  func.func @_linear_kernel(%arg0: memref<2xf32, #tpu.memory_space<smem>>, %arg1: memref<8x128xf32, #tpu.memory_space<vmem>>, %arg2: memref<1x128xf32, #tpu.memory_space<vmem>>, %arg3: memref<1x128xf32, #tpu.memory_space<vmem>>) attributes {dimension_semantics = [], scalar_prefetch = 0 : i64, scratch_operands = 0 : i64, tpu.core_type = #tpu.core_type<tc>} {
    %c0 = arith.constant 0 : index
    %0 = memref.load %arg0[%c0] : memref<2xf32, #tpu.memory_space<smem>>
    %c1 = arith.constant 1 : index
    %1 = memref.load %arg0[%c1] : memref<2xf32, #tpu.memory_space<smem>>
    %c0_0 = arith.constant 0 : index
    %c0_1 = arith.constant 0 : index
    %2 = vector.load %arg1[%c0_0, %c0_1] : memref<8x128xf32, #tpu.memory_space<vmem>>, vector<1x128xf32>
    %3 = vector.broadcast %0 : f32 to vector<1x128xf32>
    %4 = arith.mulf %3, %2 : vector<1x128xf32>
    %c1_2 = arith.constant 1 : index
    %c0_3 = arith.constant 0 : index
    %5 = vector.load %arg1[%c1_2, %c0_3] : memref<8x128xf32, #tpu.memory_space<vmem>>, vector<1x128xf32>
    %6 = vector.broadcast %1 : f32 to vector<1x128xf32>
    %7 = arith.mulf %6, %5 : vector<1x128xf32>
    %8 = arith.addf %4, %7 : vector<1x128xf32>
    %c0_4 = arith.constant 0 : index
    %c0_5 = arith.constant 0 : index
    %9 = vector.load %arg2[%c0_4, %c0_5] : memref<1x128xf32, #tpu.memory_space<vmem>>, vector<1x128xf32>
    %10 = arith.addf %8, %9 : vector<1x128xf32>
    %c0_6 = arith.constant 0 : index
    %c0_7 = arith.constant 0 : index
    %11 = vector.load %arg3[%c0_6, %c0_7] : memref<1x128xf32, #tpu.memory_space<vmem>>, vector<1x128xf32>
    tpu.vector_store %arg3[%c0_6, %c0_7], %10 {strides = array<i32>} : memref<1x128xf32, #tpu.memory_space<vmem>>, vector<1x128xf32>,
    return
  }
}

</mosaic_0001>

<bundles_post_ra>
// kernel: model_forward.1
= control target key start
LH: loop header
LB: loop body
LE: loop exit
PB: predicated region body
PF: predicated region fallthrough
CT: control target
= control target key end

     0   :  { %8 = vsyncpa [#allocation4], 0  ;;  %s136_s0 = inlined_call_operand.hbm [shape: f32[2], index: 0, kind: input, shape index: {}]   ;;  %s137_s1 = inlined_call_operand.hbm [shape: f32[8,128], index: 1, kind: input, shape index: {}]   ;;  %s138_s2 = inlined_call_operand.vmem [shape: f32[1,128], index: 2, kind: input, shape index: {}]   ;;  %s139_s3 = inlined_call_operand.vmem [shape: f32[1,128], index: 3, kind: output, shape index: {}]  }
   0x1   :  { %s15_s14 = sshll.u32 %s136_s0, 4  ;;  %s16_s14 = int_to_ptr.hbm [resolvable:$true] %s15_s14 }
   0x2   :  { %9 = vsyncpa [#allocation3], 0  ;;  %s24_s17 = sshll.u32 %s137_s1, 4  ;;  %s102_s18 = smov [#allocation2]   ;;  %s25_s17 = int_to_ptr.hbm [resolvable:$true] %s24_s17 }
   0x3   :  { %18 = dma.hbm_to_smem %s16_s14, 16, %s102_s18, [#allocation4]  }
   0x4   :  { %s103_s19 = smov [#allocation5]  }
   0x5   :  { %s26_s20 = sshll.u32 %s103_s19, 4  ;;  %s27_s20 = int_to_ptr.vmem [resolvable:$true] %s26_s20 }
   0x6   :  { %29 = dma.hbm_to_vmem [thread:$0]  %s25_s17, 128, %s27_s20, [#allocation3]  }
   0x7   :  { %98 = dma.done.wait [#allocation4], 16  }
   0x8   :  { %99 = vsyncadd [#allocation4], 4294967280 }
   0x9   :  { %100 = dma.done.wait [#allocation3], 128  }
   0xa   :  { %101 = vsyncadd [#allocation3], 4294967168 }
   0xb   :  { %40 = sfence }
   0xc   :  { %s41_s21 = sld [smem:[#allocation2]]  ;;  %v43_v0 = vld [vmem:[#allocation5] sm:$0x1]  ;;  %v46_v1 = vld [vmem:[#allocation5 + $0x1] sm:$0x1] }
   0xd   :  { %s59_s0 = sld [smem:[#allocation2 + $0x1]]  ;;  %v50_v6 = vld [vmem:[%s138_s2] sm:$0x1] }
  0x12   :  { %v44_v2 = vstv %s41_s21 }
  0x13   :  { %v45_v3 = vmul.f32 %v44_v2, %v43_v0  ;;  %v47_v4 = vstv %s59_s0 }
  0x14   :  { %v48_v5 = vmul.f32 %v47_v4, %v46_v1 }
  0x16   :  { %v49_v7 = vadd.f32 %v48_v5, %v45_v3 }
  0x18   :  { %v51_v8 = vadd.f32 %v50_v6, %v49_v7 }
  0x1a   :  { %52 = vst [vmem:[%s139_s3] sm:$0x1] %v51_v8 }
  0x1b   :  { %57 = vsyncpa [#allocation3], 1 }
  0x1c   :  { %58 = vsyncpa [#allocation4], 1 }

</bundles_post_ra>
